<compile_context>
chip_gen: v6e
topology: v6e:2x2x1
jax: 0.10.0
libtpu: 0.0.40
codegen_flags: <defaults>
</compile_context>

<pallas_src>
import functools
import math

import numpy as np
import jax
import jax.numpy as jnp
from jax import lax
from jax.experimental import pallas as pl
from jax.experimental.pallas import tpu as pltpu

NEG_INF = -1e18


def _gelu(x):
    # TODO(synk): tanh-approx GELU inside kernels (exact-erf nn.GELU differs by <1e-3).
    return jax.nn.gelu(x, approximate=True)


# ============================================================================ kernels

# ---------------------------------------------------------------- fused transformer
def _transformer_kernel(lens_ref, x_ref, we, be, wqkv, bqkv, wo, bo, wf1, bf1, wf2, bf2,
                        pooled_ref, h_ref, *, H, scale):
    b = pl.program_id(0)
    length = lens_ref[b]
    x = x_ref[0]                                                     # (L, Din)
    L = x.shape[0]

    h = jnp.dot(x, we[...], preferred_element_type=jnp.float32) + be[...]          # (L, H)
    qkv = jnp.dot(h, wqkv[...], preferred_element_type=jnp.float32) + bqkv[...]    # (L, 3H)
    q = qkv[:, :H]
    k = qkv[:, H:2 * H]
    v = qkv[:, 2 * H:3 * H]

    s = jnp.dot(q, k.T, preferred_element_type=jnp.float32) * scale                # (L, L)
    col = lax.broadcasted_iota(jnp.int32, (L, L), 1)
    s = jnp.where(col >= length, NEG_INF, s)                 # mask built in-kernel
    s = s - jnp.max(s, axis=-1, keepdims=True)
    e = jnp.exp(s)
    p = e * pl.reciprocal(jnp.sum(e, axis=-1, keepdims=True), approx=True)
    a = jnp.dot(p, v, preferred_element_type=jnp.float32)

    h = h + jnp.dot(a, wo[...], preferred_element_type=jnp.float32) + bo[...]
    ff = _gelu(jnp.dot(h, wf1[...], preferred_element_type=jnp.float32) + bf1[...])
    h = h + jnp.dot(ff, wf2[...], preferred_element_type=jnp.float32) + bf2[...]
    h_ref[0] = h

    # masked mean over valid tokens (== uniform softmax over non-pad positions)
    row = lax.broadcasted_iota(jnp.int32, (L, 1), 0)
    valid = (row < length).astype(jnp.float32)                                      # (L, 1)
    denom = jnp.maximum(jnp.sum(valid, axis=0, keepdims=True), 1.0)
    pooled_ref[0] = jnp.sum(h * valid, axis=0, keepdims=True) / denom               # (1, H)


def transformer_forward(p, x, lens):
    """Fused single-layer transformer; returns (pooled (B,H), hidden (B,L,H))."""
    B, L, Din = x.shape
    H = p["we"].shape[1]
    scale = 1.0 / math.sqrt(H)
    pooled, h = pl.pallas_call(
        functools.partial(_transformer_kernel, H=H, scale=scale),
        out_shape=(jax.ShapeDtypeStruct((B, 1, H), jnp.float32),
                   jax.ShapeDtypeStruct((B, L, H), jnp.float32)),
        grid_spec=pltpu.PrefetchScalarGridSpec(
            num_scalar_prefetch=1, grid=(B,),
            in_specs=[
                pl.BlockSpec((1, L, Din), lambda b, lens: (b, 0, 0)),
                pl.BlockSpec((Din, H),     lambda b, lens: (0, 0)),
                pl.BlockSpec((1, H),       lambda b, lens: (0, 0)),
                pl.BlockSpec((H, 3 * H),   lambda b, lens: (0, 0)),   # packed QKV (lane-dense)
                pl.BlockSpec((1, 3 * H),   lambda b, lens: (0, 0)),
                pl.BlockSpec((H, H),       lambda b, lens: (0, 0)),
                pl.BlockSpec((1, H),       lambda b, lens: (0, 0)),
                pl.BlockSpec((H, 4 * H),   lambda b, lens: (0, 0)),
                pl.BlockSpec((1, 4 * H),   lambda b, lens: (0, 0)),
                pl.BlockSpec((4 * H, H),   lambda b, lens: (0, 0)),
                pl.BlockSpec((1, H),       lambda b, lens: (0, 0)),
            ],
            out_specs=[pl.BlockSpec((1, 1, H), lambda b, lens: (b, 0, 0)),
                       pl.BlockSpec((1, L, H), lambda b, lens: (b, 0, 0))],
        ),
        compiler_params=pltpu.CompilerParams(dimension_semantics=("parallel",)),
    )(lens.astype(jnp.int32), x.astype(jnp.float32),
      p["we"], p["be"].reshape(1, -1),
      p["wqkv"], p["bqkv"].reshape(1, -1),
      p["wo"], p["bo"].reshape(1, -1),
      p["wf1"], p["bf1"].reshape(1, -1),
      p["wf2"], p["bf2"].reshape(1, -1))
    return pooled[:, 0, :], h


# ------------- fused: mot-score linear + sliding-window pools + mot_fc + app_fc
def _local_feats_kernel(lens_ref, x_ref, wm_ref, bm_ref, wmf_ref, bmf_ref,
                        waf_ref, baf_ref, mot_ref, app_ref, *, nwin):
    i = pl.program_id(0)
    L = lens_ref[i]
    x = x_ref[0]                                                     # (clen, D)
    clen = x.shape[0]

    # mot_wei linear as a VPU multiply + lane reduce (avoids an N=1 matmul)
    scores = jnp.sum(x * wm_ref[...], axis=-1, keepdims=True) + bm_ref[...]   # (clen, 1)
    row = lax.broadcasted_iota(jnp.int32, (clen, 1), 0)
    scores = jnp.where(row >= L, NEG_INF, scores)

    s0 = scores[0:nwin]
    s1 = scores[1:nwin + 1]
    s2 = scores[2:nwin + 2]
    m = jnp.maximum(jnp.maximum(s0, s1), s2)
    e0 = jnp.exp(s0 - m)
    e1 = jnp.exp(s1 - m)
    e2 = jnp.exp(s2 - m)
    inv = pl.reciprocal(e0 + e1 + e2, approx=True)
    vid_clip = ((e0 * inv) * x[0:nwin]
                + (e1 * inv) * x[1:nwin + 1]
                + (e2 * inv) * x[2:nwin + 2])                        # (nwin, D)

    mot_ref[0] = _gelu(jnp.dot(vid_clip, wmf_ref[...],
                               preferred_element_type=jnp.float32) + bmf_ref[...])
    app_ref[0] = _gelu(jnp.dot(x, waf_ref[...],
                               preferred_element_type=jnp.float32) + baf_ref[...])


def local_features(clip_ft, clip_lens, mot_wei, mot_fc, app_fc):
    NS, clen, D = clip_ft.shape
    nwin = clen - 2
    w_mot, b_mot = mot_wei
    w_mf, b_mf = mot_fc
    w_af, b_af = app_fc
    H = w_mf.shape[1]
    mot, app = pl.pallas_call(
        functools.partial(_local_feats_kernel, nwin=nwin),
        out_shape=(jax.ShapeDtypeStruct((NS, nwin, H), jnp.float32),
                   jax.ShapeDtypeStruct((NS, clen, H), jnp.float32)),
        grid_spec=pltpu.PrefetchScalarGridSpec(
            num_scalar_prefetch=1, grid=(NS,),
            in_specs=[pl.BlockSpec((1, clen, D), lambda i, lens: (i, 0, 0)),
                      pl.BlockSpec((1, D), lambda i, lens: (0, 0)),
                      pl.BlockSpec((1, 1), lambda i, lens: (0, 0)),
                      pl.BlockSpec((D, H), lambda i, lens: (0, 0)),
                      pl.BlockSpec((1, H), lambda i, lens: (0, 0)),
                      pl.BlockSpec((D, H), lambda i, lens: (0, 0)),
                      pl.BlockSpec((1, H), lambda i, lens: (0, 0))],
            out_specs=[pl.BlockSpec((1, nwin, H), lambda i, lens: (i, 0, 0)),
                       pl.BlockSpec((1, clen, H), lambda i, lens: (i, 0, 0))],
        ),
        compiler_params=pltpu.CompilerParams(dimension_semantics=("parallel",)),
    )(clip_lens.astype(jnp.int32), clip_ft.astype(jnp.float32),
      w_mot.reshape(1, -1).astype(jnp.float32),
      jnp.asarray(b_mot, jnp.float32).reshape(1, 1),
      w_mf.astype(jnp.float32), b_mf.reshape(1, -1).astype(jnp.float32),
      w_af.astype(jnp.float32), b_af.reshape(1, -1).astype(jnp.float32))
    return mot, app


# ------ fused: attention-GCN + gcn_pooling GCN + pooling_ft + masked softmax pools
def _gcn_attn_pool_kernel(lens_ref, x_ref, adj_ref, adjn_ref, wa_ref, ba_ref, w_ref, b_ref,
                          w2_ref, b2_ref, wp_ref, bp_ref,
                          node_ref, mot_ref, app_ref, *, scale, nwin, clen):
    i = pl.program_id(0)
    L = lens_ref[i]
    x = x_ref[0]                                                     # (N, H)

    # attention GCN layer (pos and neg graphs share weights & adjacency)
    q = jnp.dot(x, wa_ref[...], preferred_element_type=jnp.float32) + ba_ref[...]
    s = jnp.dot(q, x.T, preferred_element_type=jnp.float32) * scale
    s = jnp.where(adj_ref[...] == 0.0, NEG_INF, s)
    s = s - jnp.max(s, axis=-1, keepdims=True)
    e = jnp.exp(s)
    p = e * pl.reciprocal(jnp.sum(e, axis=-1, keepdims=True), approx=True)
    prop = jnp.dot(p, x, preferred_element_type=jnp.float32)
    node2 = jnp.maximum(
        jnp.dot(prop, w_ref[...], preferred_element_type=jnp.float32) + b_ref[...], 0.0)
    node_ref[0] = node2

    # gcn_pooling (plain, normalized adjacency) + pooling_ft, reusing node2 from VMEM
    prop2 = jnp.dot(adjn_ref[...], node2, preferred_element_type=jnp.float32)
    n3 = jnp.maximum(
        jnp.dot(prop2, w2_ref[...], preferred_element_type=jnp.float32) + b2_ref[...], 0.0)
    scores = _gelu(jnp.sum(n3 * wp_ref[...], axis=-1, keepdims=True) + bp_ref[...])  # (N,1)

    mot_sc = scores[1:1 + nwin]
    app_sc = scores[1 + nwin:1 + nwin + clen]
    mot_x = node2[1:1 + nwin]
    app_x = node2[1 + nwin:1 + nwin + clen]

    r_m = lax.broadcasted_iota(jnp.int32, (nwin, 1), 0)
    r_a = lax.broadcasted_iota(jnp.int32, (clen, 1), 0)
    mot_sc = jnp.where(r_m >= L - 2, NEG_INF, mot_sc)
    app_sc = jnp.where(r_a >= L, NEG_INF, app_sc)

    def pool(sc, vals):
        sc = sc - jnp.max(sc, axis=0, keepdims=True)
        ee = jnp.exp(sc)
        pp = ee * pl.reciprocal(jnp.sum(ee, axis=0, keepdims=True), approx=True)
        return jnp.sum(vals * pp, axis=0, keepdims=True)              # (1, H)

    mot_ref[0] = pool(mot_sc, mot_x)
    app_ref[0] = pool(app_sc, app_x)


def gcn_attn_pool_forward(p_gcn, p_gcn_pool, p_pool_ft, x, adj, lens, nwin, clen):
    """x is pos ++ neg stacked along batch; pooled outputs are only valid for pos rows."""
    # TODO(synk): GCNEncoder source not provided; single attention-GCN layer approximation.
    Bt, N, H = x.shape
    wa, ba = p_gcn["wa"]
    w, b = p_gcn["w"]
    w2, b2 = p_gcn_pool["w"]
    wp, bp = p_pool_ft
    adjn = (adj / jnp.maximum(adj.sum(axis=-1, keepdims=True), 1e-6)).astype(jnp.float32)
    node2, mot, app = pl.pallas_call(
        functools.partial(_gcn_attn_pool_kernel, scale=1.0 / math.sqrt(H),
                          nwin=nwin, clen=clen),
        out_shape=(jax.ShapeDtypeStruct((Bt, N, H), jnp.float32),
                   jax.ShapeDtypeStruct((Bt, 1, H), jnp.float32),
                   jax.ShapeDtypeStruct((Bt, 1, H), jnp.float32)),
        grid_spec=pltpu.PrefetchScalarGridSpec(
            num_scalar_prefetch=1, grid=(Bt,),
            in_specs=[pl.BlockSpec((1, N, H), lambda i, lens: (i, 0, 0)),
                      pl.BlockSpec((N, N), lambda i, lens: (0, 0)),   # shared adjacency
                      pl.BlockSpec((N, N), lambda i, lens: (0, 0)),   # shared normed adjacency
                      pl.BlockSpec((H, H), lambda i, lens: (0, 0)),
                      pl.BlockSpec((1, H), lambda i, lens: (0, 0)),
                      pl.BlockSpec((H, H), lambda i, lens: (0, 0)),
                      pl.BlockSpec((1, H), lambda i, lens: (0, 0)),
                      pl.BlockSpec((H, H), lambda i, lens: (0, 0)),
                      pl.BlockSpec((1, H), lambda i, lens: (0, 0)),
                      pl.BlockSpec((1, H), lambda i, lens: (0, 0)),
                      pl.BlockSpec((1, 1), lambda i, lens: (0, 0))],
            out_specs=[pl.BlockSpec((1, N, H), lambda i, lens: (i, 0, 0)),
                       pl.BlockSpec((1, 1, H), lambda i, lens: (i, 0, 0)),
                       pl.BlockSpec((1, 1, H), lambda i, lens: (i, 0, 0))],
        ),
        compiler_params=pltpu.CompilerParams(dimension_semantics=("parallel",)),
    )(lens.astype(jnp.int32), x.astype(jnp.float32), adj.astype(jnp.float32), adjn,
      wa, ba.reshape(1, -1), w, b.reshape(1, -1), w2, b2.reshape(1, -1),
      wp.reshape(1, -1), jnp.asarray(bp, jnp.float32).reshape(1, 1))
    return node2, mot[:, 0, :], app[:, 0, :]


# ---------------------------------------------------------------- plain GCN (global)
def _gcn_plain_kernel(x_ref, adjn_ref, w_ref, b_ref, o_ref):
    x = x_ref[0]
    prop = jnp.dot(adjn_ref[...], x, preferred_element_type=jnp.float32)
    o_ref[0] = jnp.maximum(
        jnp.dot(prop, w_ref[...], preferred_element_type=jnp.float32) + b_ref[...], 0.0)


def gcn_plain_forward(p, x, adj):
    B, N, H = x.shape
    w, b = p["w"]
    adjn = (adj / jnp.maximum(adj.sum(axis=-1, keepdims=True), 1e-6)).astype(jnp.float32)
    return pl.pallas_call(
        _gcn_plain_kernel,
        out_shape=jax.ShapeDtypeStruct((B, N, H), jnp.float32),
        grid=(B,),
        in_specs=[pl.BlockSpec((1, N, H), lambda i: (i, 0, 0)),
                  pl.BlockSpec((N, N), lambda i: (0, 0)),      # shared adjacency, VMEM-resident
                  pl.BlockSpec((H, H), lambda i: (0, 0)),
                  pl.BlockSpec((1, H), lambda i: (0, 0))],
        out_specs=pl.BlockSpec((1, N, H), lambda i: (i, 0, 0)),
        compiler_params=pltpu.CompilerParams(dimension_semantics=("parallel",)),
    )(x.astype(jnp.float32), adjn, w, b.reshape(1, -1))


# ----------------------------------------------------------- fused discriminator
def _disc_kernel(c_ref, w_ref, hp_ref, hn_ref, op_ref, on_ref):
    cW = jnp.dot(c_ref[0], w_ref[...], preferred_element_type=jnp.float32)   # (1, H)
    op_ref[0] = jnp.sum(hp_ref[0] * cW, axis=-1, keepdims=True)              # (N, 1)
    on_ref[0] = jnp.sum(hn_ref[0] * cW, axis=-1, keepdims=True)


def discriminator_forward(W, c, h_pos, h_neg):
    # TODO(synk): Discriminator source not provided; DGI-style bilinear scoring.
    B, N, H = h_pos.shape
    sp, sn = pl.pallas_call(
        _disc_kernel,
        out_shape=(jax.ShapeDtypeStruct((B, N, 1), jnp.float32),
                   jax.ShapeDtypeStruct((B, N, 1), jnp.float32)),
        grid=(B,),
        in_specs=[pl.BlockSpec((1, 1, H), lambda i: (i, 0, 0)),
                  pl.BlockSpec((H, H), lambda i: (0, 0)),
                  pl.BlockSpec((1, N, H), lambda i: (i, 0, 0)),
                  pl.BlockSpec((1, N, H), lambda i: (i, 0, 0))],
        out_specs=[pl.BlockSpec((1, N, 1), lambda i: (i, 0, 0)),
                   pl.BlockSpec((1, N, 1), lambda i: (i, 0, 0))],
        compiler_params=pltpu.CompilerParams(dimension_semantics=("parallel",)),
    )(c.reshape(B, 1, H).astype(jnp.float32), W.astype(jnp.float32),
      h_pos.astype(jnp.float32), h_neg.astype(jnp.float32))
    return jnp.concatenate([sp[:, :, 0], sn[:, :, 0]], axis=1)               # (B, 2N)


# ============================================================================ glue

def bce_with_logits(logits, labels):
    return jnp.mean(jnp.maximum(logits, 0.0) - logits * labels
                    + jnp.log1p(jnp.exp(-jnp.abs(logits))))


# ============================================================================ params

def init_params(key, input_size, H):
    keys = jax.random.split(key, 16)

    def dense(k, fi, fo):
        kw, kb = jax.random.split(k)
        return (jax.random.normal(kw, (fi, fo), jnp.float32) * 0.02,
                jax.random.normal(kb, (fo,), jnp.float32) * 0.02)

    def tfm(k, din):
        ks = jax.random.split(k, 7)
        we, be = dense(ks[0], din, H)
        wq, bq = dense(ks[1], H, H)
        wk, bk = dense(ks[2], H, H)
        wv, bv = dense(ks[3], H, H)
        wo, bo = dense(ks[4], H, H)
        wf1, bf1 = dense(ks[5], H, 4 * H)
        wf2, bf2 = dense(ks[6], 4 * H, H)
        return dict(we=we, be=be,
                    wqkv=jnp.concatenate([wq, wk, wv], axis=1),   # packed QKV (N=3H lane-dense)
                    bqkv=jnp.concatenate([bq, bk, bv], axis=0),
                    wo=wo, bo=bo, wf1=wf1, bf1=bf1, wf2=wf2, bf2=bf2)

    def gcn(k, attention):
        ks = jax.random.split(k, 2)
        p = dict(w=dense(ks[0], H, H))
        if attention:
            p["wa"] = dense(ks[1], H, H)
        return p

    return dict(
        mot_wei=dense(keys[0], input_size, 1),
        mot_fc=dense(keys[1], input_size, H),
        app_fc=dense(keys[2], input_size, H),
        pooling_ft=dense(keys[3], H, 1),
        transformer_local=tfm(keys[4], input_size),
        transformer_global=tfm(keys[5], H),
        gcn=gcn(keys[6], True),
        gcn_global=gcn(keys[7], False),
        gcn_pooling=gcn(keys[8], False),
        disc=jax.random.normal(keys[9], (H, H), jnp.float32) * 0.02,
        disc_global=jax.random.normal(keys[10], (H, H), jnp.float32) * 0.02,
    )


# ============================================================================ forward

def multilevel_encoder_forward(params, cfg, vid_ft, vid_len, clip_ft, clip_lens,
                               seg_nums, clip_edges, gedges, perms):
    B, vlen, _ = vid_ft.shape
    H = cfg["dim_embed"]
    NS, clen, D = clip_ft.shape
    assert clen == 20, "forward hard-codes node slices 1:19 / 19: (clen must be 20)"
    nwin = clen - 2
    max_seg_len = int(max(seg_nums))
    max_dataclip_len = cfg["node_num"]

    # ---- local level ------------------------------------------------------------
    global_embeds, _ = transformer_forward(params["transformer_local"], vid_ft, vid_len)
    segment_embeds1, _ = transformer_forward(params["transformer_local"], clip_ft, clip_lens)

    # fused mot-score linear + all 18 sliding-window softmax pools + mot_fc + app_fc
    motion_embeds1, appearance_embeds1 = local_features(
        clip_ft, clip_lens, params["mot_wei"], params["mot_fc"], params["app_fc"])

    node_embeds1 = jnp.concatenate(
        [segment_embeds1[:, None], motion_embeds1, appearance_embeds1], 1)
    motion_perm = motion_embeds1[:, perms["local_mot"]]
    appearance_perm = appearance_embeds1[:, perms["local_obj"]]
    node_embeds_neg = jnp.concatenate(
        [segment_embeds1[:, None], motion_perm, appearance_perm], 1)

    # pos + neg graphs stacked -> SINGLE fused attention-GCN + pooling launch
    lens2 = jnp.concatenate([clip_lens, clip_lens], 0)
    gcn_out, mot_pool, app_pool = gcn_attn_pool_forward(
        params["gcn"], params["gcn_pooling"], params["pooling_ft"],
        jnp.concatenate([node_embeds1, node_embeds_neg], 0),
        clip_edges, lens2, nwin, clen)
    node_embeds2, node_embeds_neg2 = gcn_out[:NS], gcn_out[NS:]

    segment_embeds2 = node_embeds2[:, 0]
    motion_embeds2 = node_embeds2[:, 1:1 + nwin]
    appearance_embeds2 = node_embeds2[:, 1 + nwin:]
    motion_embeds_neg2 = node_embeds_neg2[:, 1:1 + nwin]
    appearance_embeds_neg2 = node_embeds_neg2[:, 1 + nwin:]

    motion_embeds3 = mot_pool[:NS]           # pooled outputs only meaningful for pos graphs
    appearance_embeds3 = app_pool[:NS]

    c_local_mot = jax.nn.sigmoid(motion_embeds3)
    c_local_obj = jax.nn.sigmoid(appearance_embeds3)
    ret_local_mot = discriminator_forward(params["disc"], c_local_mot,
                                          motion_embeds2, motion_embeds_neg2)
    ret_local_obj = discriminator_forward(params["disc"], c_local_obj,
                                          appearance_embeds2, appearance_embeds_neg2)

    lbl_mot = jnp.concatenate([jnp.ones((NS, nwin)), jnp.zeros((NS, nwin))], 1)
    ret_local_mot_loss = bce_with_logits(ret_local_mot, lbl_mot)
    lbl_obj = jnp.concatenate([jnp.ones((NS, clen)), jnp.zeros((NS, clen))], 1)
    ret_local_obj_loss = bce_with_logits(ret_local_obj, lbl_obj)

    # ---- reshape flattened segments back to per-video sequences (single gather) --
    offsets = np.concatenate([[0], np.cumsum(seg_nums)[:-1]]).astype(np.int32)
    idx_np = np.zeros((B, max_seg_len), np.int32)
    valid_np = np.zeros((B, max_seg_len), bool)
    for bn, cl in enumerate(seg_nums):
        idx_np[bn, :cl] = offsets[bn] + np.arange(cl)
        valid_np[bn, :cl] = True
    idx_j = jnp.asarray(idx_np)
    valid_j = jnp.asarray(valid_np)
    sent_emb_lens = jnp.asarray(list(seg_nums), jnp.int32)

    def repack(flat):
        return jnp.where(valid_j[..., None], flat[idx_j], 0.0)

    app_emb_reshape1 = repack(appearance_embeds3)

    # PyTorch computes three global-transformer passes (seg/mot/app), but the in-place
    # aliasing bug below makes the seg/mot outputs unreachable; only the app pass is
    # live, so it is the only one computed (pure dead-code elimination, same result).
    _, app_emb_reshape2 = transformer_forward(params["transformer_global"],
                                              app_emb_reshape1, sent_emb_lens)

    # Reproduce the PyTorch in-place aliasing: seg/mot/app_emb_reshape3 all end up equal
    # to the buffer whose [:, :max_seg_len] holds app_emb_reshape2.
    new_emb0 = jnp.zeros((B, max_dataclip_len, H), jnp.float32)
    new_emb0 = new_emb0.at[:, :max_seg_len].set(app_emb_reshape2)
    seg_emb_reshape3 = mot_emb_reshape3 = app_emb_reshape3 = new_emb0

    new_emb_in = jnp.concatenate([global_embeds[:, None], seg_emb_reshape3,
                                  mot_emb_reshape3, app_emb_reshape3], 1)
    # (Original code draws all three negatives from seg_emb_reshape3 — reproduced.)
    seg_neg = seg_emb_reshape3[:, perms["global_seg"]]
    mot_neg = seg_emb_reshape3[:, perms["global_mot"]]
    obj_neg = seg_emb_reshape3[:, perms["global_obj"]]
    new_emb_neg_in = jnp.concatenate([global_embeds[:, None], seg_neg, mot_neg, obj_neg], 1)

    # pos + neg global graphs stacked -> single plain-GCN launch
    g_out = gcn_plain_forward(params["gcn_global"],
                              jnp.concatenate([new_emb_in, new_emb_neg_in], 0), gedges)
    new_emb, new_neg = g_out[:B], g_out[B:]

    global_embeds2 = new_emb[:, 0]
    seg_emb_reshape4 = new_emb[:, 1:1 + max_dataclip_len]
    mot_emb_reshape4 = new_emb[:, 1 + max_dataclip_len:1 + 2 * max_dataclip_len]
    app_emb_reshape4 = new_emb[:, 1 + 2 * max_dataclip_len:]
    seg_emb_neg = new_neg[:, 1:1 + max_dataclip_len]
    mot_emb_neg = new_neg[:, 1 + max_dataclip_len:1 + 2 * max_dataclip_len]
    obj_emb_neg = new_neg[:, 1 + 2 * max_dataclip_len:]

    len_div = sent_emb_lens[:, None].astype(jnp.float32)
    seg_emb_reshape = jnp.sum(seg_emb_reshape4[:, :max_seg_len], axis=1) / len_div
    mot_emb_reshape = jnp.sum(mot_emb_reshape4[:, :max_seg_len], axis=1) / len_div
    app_emb_reshape = jnp.sum(app_emb_reshape4[:, :max_seg_len], axis=1) / len_div
    fusion_embeds = jnp.concatenate([global_embeds2, seg_emb_reshape,
                                     mot_emb_reshape, app_emb_reshape], axis=-1)

    # three global discriminators batched into ONE launch
    c_stack = jnp.concatenate([jax.nn.sigmoid(seg_emb_reshape),
                               jax.nn.sigmoid(mot_emb_reshape),
                               jax.nn.sigmoid(app_emb_reshape)], 0)
    hp_stack = jnp.concatenate([seg_emb_reshape4, mot_emb_reshape4, app_emb_reshape4], 0)
    hn_stack = jnp.concatenate([seg_emb_neg, mot_emb_neg, obj_emb_neg], 0)
    ret_g = discriminator_forward(params["disc_global"], c_stack, hp_stack, hn_stack)
    ret_global_seg = ret_g[:B]
    ret_global_mot = ret_g[B:2 * B]
    ret_global_obj = ret_g[2 * B:]

    lbl_g = jnp.concatenate([jnp.ones((B, max_dataclip_len)),
                             jnp.zeros((B, max_dataclip_len))], 1)
    ret_global_seg_loss = bce_with_logits(ret_global_seg, lbl_g)
    ret_global_mot_loss = bce_with_logits(ret_global_mot, lbl_g)
    ret_global_obj_loss = bce_with_logits(ret_global_obj, lbl_g)

    return (fusion_embeds, global_embeds2, segment_embeds2, motion_embeds3, appearance_embeds3,
            ret_local_mot_loss, ret_local_obj_loss,
            ret_global_seg_loss, ret_global_mot_loss, ret_global_obj_loss)


# ============================================================================ main

if __name__ == "__main__":
    B, vlen = 2, 8
    input_size = 32          # sum(config.dim_fts)
    H = 32                   # config.dim_embed
    clen = 20                # required by the hard-coded 1:19 / 19: node slices
    node_num = 4             # config.node_num (max_dataclip_len)
    seg_nums = [3, 2]
    NS = sum(seg_nums)

    key = jax.random.PRNGKey(0)
    k1, k2, kp = jax.random.split(key, 3)
    vid_ft = jax.random.normal(k1, (B, vlen, input_size), jnp.float32)
    clip_ft = jax.random.normal(k2, (NS, clen, input_size), jnp.float32)
    vid_len = jnp.array([6, 8], jnp.int32)
    clip_lens = jnp.array([20, 15, 10, 18, 12], jnp.int32)

    n_local = 1 + (clen - 2) + clen        # 39 nodes in the local graph
    n_global = 1 + 3 * node_num            # 13 nodes in the global graph
    ce = np.eye(n_local, dtype=np.float32); ce[0, :] = 1.0; ce[:, 0] = 1.0
    ge = np.eye(n_global, dtype=np.float32); ge[0, :] = 1.0; ge[:, 0] = 1.0
    clip_edges = jnp.asarray(ce)
    gedges = jnp.asarray(ge)

    params = init_params(kp, input_size, H)

    rng = np.random.RandomState(0)         # deterministic stand-in for np.random.permutation
    perms = {
        "local_mot": jnp.asarray(rng.permutation(clen - 2)),
        "local_obj": jnp.asarray(rng.permutation(clen)),
        "global_seg": jnp.asarray(rng.permutation(node_num)),
        "global_mot": jnp.asarray(rng.permutation(node_num)),
        "global_obj": jnp.asarray(rng.permutation(node_num)),
    }

    cfg = {"dim_embed": H, "node_num": node_num}
    outs = multilevel_encoder_forward(params, cfg, vid_ft, vid_len, clip_ft, clip_lens,
                                      seg_nums, clip_edges, gedges, perms)
    outs = jax.block_until_ready(outs)

    assert outs[0].shape == (B, 4 * H)
    assert outs[1].shape == (B, H)
    assert outs[2].shape == (NS, H)
    assert outs[3].shape == (NS, H)
    assert outs[4].shape == (NS, H)
    assert all(bool(jnp.all(jnp.isfinite(o))) for o in outs)
    print("KERNEL_OK")
</pallas_src>

<mosaic_0001>
module attributes {stable_mosaic.version = 11 : i64} {
  func.func @_transformer_kernel(%arg0: i32, %arg1: memref<2xi32, #tpu.memory_space<smem>>, %arg2: memref<1x8x32xf32, #tpu.memory_space<vmem>>, %arg3: memref<32x32xf32, #tpu.memory_space<vmem>>, %arg4: memref<1x32xf32, #tpu.memory_space<vmem>>, %arg5: memref<32x96xf32, #tpu.memory_space<vmem>>, %arg6: memref<1x96xf32, #tpu.memory_space<vmem>>, %arg7: memref<32x32xf32, #tpu.memory_space<vmem>>, %arg8: memref<1x32xf32, #tpu.memory_space<vmem>>, %arg9: memref<32x128xf32, #tpu.memory_space<vmem>>, %arg10: memref<1x128xf32, #tpu.memory_space<vmem>>, %arg11: memref<128x32xf32, #tpu.memory_space<vmem>>, %arg12: memref<1x32xf32, #tpu.memory_space<vmem>>, %arg13: memref<1x1x32xf32, #tpu.memory_space<vmem>>, %arg14: memref<1x8x32xf32, #tpu.memory_space<vmem>>) attributes {dimension_semantics = [#tpu.dimension_semantics<parallel>], iteration_bounds = array<i64: 2>, scalar_prefetch = 1 : i64, scratch_operands = 0 : i64, tpu.core_type = #tpu.core_type<tc>, window_params = [{transform_indices = @transform_0, window_bounds = array<i64: 1, 8, 32>}, {pipeline_mode = #tpu.pipeline_mode<synchronous>, transform_indices = @transform_1, window_bounds = array<i64: 32, 32>}, {pipeline_mode = #tpu.pipeline_mode<synchronous>, transform_indices = @transform_2, window_bounds = array<i64: 1, 32>}, {pipeline_mode = #tpu.pipeline_mode<synchronous>, transform_indices = @transform_3, window_bounds = array<i64: 32, 96>}, {pipeline_mode = #tpu.pipeline_mode<synchronous>, transform_indices = @transform_4, window_bounds = array<i64: 1, 96>}, {pipeline_mode = #tpu.pipeline_mode<synchronous>, transform_indices = @transform_5, window_bounds = array<i64: 32, 32>}, {pipeline_mode = #tpu.pipeline_mode<synchronous>, transform_indices = @transform_6, window_bounds = array<i64: 1, 32>}, {pipeline_mode = #tpu.pipeline_mode<synchronous>, transform_indices = @transform_7, window_bounds = array<i64: 32, 128>}, {pipeline_mode = #tpu.pipeline_mode<synchronous>, transform_indices = @transform_8, window_bounds = array<i64: 1, 128>}, {pipeline_mode = #tpu.pipeline_mode<synchronous>, transform_indices = @transform_9, window_bounds = array<i64: 128, 32>}, {pipeline_mode = #tpu.pipeline_mode<synchronous>, transform_indices = @transform_10, window_bounds = array<i64: 1, 32>}, {transform_indices = @transform_11, window_bounds = array<i64: 1, 1, 32>}, {transform_indices = @transform_12, window_bounds = array<i64: 1, 8, 32>}]} {
    %0 = arith.index_cast %arg0 : i32 to index
    %1 = memref.load %arg1[%0] : memref<2xi32, #tpu.memory_space<smem>>
    %c0 = arith.constant 0 : index
    %c0_0 = arith.constant 0 : index
    %c0_1 = arith.constant 0 : index
    %2 = vector.load %arg2[%c0, %c0_0, %c0_1] : memref<1x8x32xf32, #tpu.memory_space<vmem>>, vector<1x8x32xf32>
    %3 = vector.shape_cast %2 : vector<1x8x32xf32> to vector<8x32xf32>
    %c0_2 = arith.constant 0 : index
    %c0_3 = arith.constant 0 : index
    %4 = vector.load %arg3[%c0_2, %c0_3] : memref<32x32xf32, #tpu.memory_space<vmem>>, vector<32x32xf32>
    %cst = arith.constant dense<0.000000e+00> : vector<8x32xf32>
    %5 = tpu.matmul %3, %4, %cst {dimension_numbers = #tpu.dot_dimension_numbers<[1], [0], [0], [1], [0, 0, 1, 1], [], []>} : vector<8x32xf32>, vector<32x32xf32>, vector<8x32xf32> -> vector<8x32xf32>
    %c0_4 = arith.constant 0 : index
    %c0_5 = arith.constant 0 : index
    %6 = vector.load %arg4[%c0_4, %c0_5] : memref<1x32xf32, #tpu.memory_space<vmem>>, vector<1x32xf32>
    %7 = vector.broadcast %6 : vector<1x32xf32> to vector<8x32xf32>
    %8 = arith.addf %5, %7 : vector<8x32xf32>
    %c0_6 = arith.constant 0 : index
    %c0_7 = arith.constant 0 : index
    %9 = vector.load %arg5[%c0_6, %c0_7] : memref<32x96xf32, #tpu.memory_space<vmem>>, vector<32x96xf32>
    %cst_8 = arith.constant dense<0.000000e+00> : vector<8x96xf32>
    %10 = tpu.matmul %8, %9, %cst_8 {dimension_numbers = #tpu.dot_dimension_numbers<[1], [0], [0], [1], [0, 0, 1, 1], [], []>} : vector<8x32xf32>, vector<32x96xf32>, vector<8x96xf32> -> vector<8x96xf32>
    %c0_9 = arith.constant 0 : index
    %c0_10 = arith.constant 0 : index
    %11 = vector.load %arg6[%c0_9, %c0_10] : memref<1x96xf32, #tpu.memory_space<vmem>>, vector<1x96xf32>
    %12 = vector.broadcast %11 : vector<1x96xf32> to vector<8x96xf32>
    %13 = arith.addf %10, %12 : vector<8x96xf32>
    %14 = vector.extract_strided_slice %13 {offsets = [0, 0], sizes = [8, 32], strides = [1, 1]} : vector<8x96xf32> to vector<8x32xf32>
    %15 = vector.extract_strided_slice %13 {offsets = [0, 32], sizes = [8, 32], strides = [1, 1]} : vector<8x96xf32> to vector<8x32xf32>
    %16 = vector.extract_strided_slice %13 {offsets = [0, 64], sizes = [8, 32], strides = [1, 1]} : vector<8x96xf32> to vector<8x32xf32>
    %17 = tpu.transpose %15, [1, 0] : vector<8x32xf32> -> vector<32x8xf32>
    %cst_11 = arith.constant dense<0.000000e+00> : vector<8x8xf32>
    %18 = tpu.matmul %14, %17, %cst_11 {dimension_numbers = #tpu.dot_dimension_numbers<[1], [0], [0], [1], [0, 0, 1, 1], [], []>} : vector<8x32xf32>, vector<32x8xf32>, vector<8x8xf32> -> vector<8x8xf32>
    %cst_12 = arith.constant 0.176776692 : f32
    %19 = vector.broadcast %cst_12 : f32 to vector<8x8xf32>
    %20 = arith.mulf %18, %19 : vector<8x8xf32>
    %21 = tpu.iota {dimensions = array<i32: 1>} : vector<8x8xi32>
    %22 = vector.broadcast %1 : i32 to vector<8x8xi32>
    %23 = arith.cmpi sge, %21, %22 : vector<8x8xi32>
    %cst_13 = arith.constant -9.99999984E+17 : f32
    %24 = vector.broadcast %cst_13 : f32 to vector<8x8xf32>
    %25 = arith.select %23, %24, %20 : vector<8x8xi1>, vector<8x8xf32>
    %cst_14 = arith.constant dense<0xFF800000> : vector<8xf32>
    %26 = vector.multi_reduction <maximumf>, %25, %cst_14 [1] : vector<8x8xf32> to vector<8xf32>
    %27 = vector.shape_cast %26 : vector<8xf32> to vector<8x1xf32>
    %28 = vector.broadcast %27 : vector<8x1xf32> to vector<8x8xf32>
    %29 = arith.subf %25, %28 : vector<8x8xf32>
    %30 = math.exp %29 : vector<8x8xf32>
    %cst_15 = arith.constant dense<0.000000e+00> : vector<8xf32>
    %31 = vector.multi_reduction <add>, %30, %cst_15 [1] : vector<8x8xf32> to vector<8xf32>
    %32 = vector.shape_cast %31 : vector<8xf32> to vector<8x1xf32>
    %33 = tpu.reciprocal %32 {approx = true} : vector<8x1xf32> -> vector<8x1xf32>
    %34 = vector.broadcast %33 : vector<8x1xf32> to vector<8x8xf32>
    %35 = arith.mulf %30, %34 : vector<8x8xf32>
    %cst_16 = arith.constant dense<0.000000e+00> : vector<8x32xf32>
    %36 = tpu.matmul %35, %16, %cst_16 {dimension_numbers = #tpu.dot_dimension_numbers<[1], [0], [0], [1], [0, 0, 1, 1], [], []>} : vector<8x8xf32>, vector<8x32xf32>, vector<8x32xf32> -> vector<8x32xf32>
    %c0_17 = arith.constant 0 : index
    %c0_18 = arith.constant 0 : index
    %37 = vector.load %arg7[%c0_17, %c0_18] : memref<32x32xf32, #tpu.memory_space<vmem>>, vector<32x32xf32>
    %cst_19 = arith.constant dense<0.000000e+00> : vector<8x32xf32>
    %38 = tpu.matmul %36, %37, %cst_19 {dimension_numbers = #tpu.dot_dimension_numbers<[1], [0], [0], [1], [0, 0, 1, 1], [], []>} : vector<8x32xf32>, vector<32x32xf32>, vector<8x32xf32> -> vector<8x32xf32>
    %39 = arith.addf %8, %38 : vector<8x32xf32>
    %c0_20 = arith.constant 0 : index
    %c0_21 = arith.constant 0 : index
    %40 = vector.load %arg8[%c0_20, %c0_21] : memref<1x32xf32, #tpu.memory_space<vmem>>, vector<1x32xf32>
    %41 = vector.broadcast %40 : vector<1x32xf32> to vector<8x32xf32>
    %42 = arith.addf %39, %41 : vector<8x32xf32>
    %c0_22 = arith.constant 0 : index
    %c0_23 = arith.constant 0 : index
    %43 = vector.load %arg9[%c0_22, %c0_23] : memref<32x128xf32, #tpu.memory_space<vmem>>, vector<32x128xf32>
    %cst_24 = arith.constant dense<0.000000e+00> : vector<8x128xf32>
    %44 = tpu.matmul %42, %43, %cst_24 {dimension_numbers = #tpu.dot_dimension_numbers<[1], [0], [0], [1], [0, 0, 1, 1], [], []>} : vector<8x32xf32>, vector<32x128xf32>, vector<8x128xf32> -> vector<8x128xf32>
    %c0_25 = arith.constant 0 : index
    %c0_26 = arith.constant 0 : index
    %45 = vector.load %arg10[%c0_25, %c0_26] : memref<1x128xf32, #tpu.memory_space<vmem>>, vector<1x128xf32>
    %46 = vector.broadcast %45 : vector<1x128xf32> to vector<8x128xf32>
    %47 = arith.addf %44, %46 : vector<8x128xf32>
    %48 = arith.mulf %47, %47 : vector<8x128xf32>
    %49 = arith.mulf %47, %48 : vector<8x128xf32>
    %cst_27 = arith.constant 4.471500e-02 : f32
    %50 = vector.broadcast %cst_27 : f32 to vector<8x128xf32>
    %51 = arith.mulf %50, %49 : vector<8x128xf32>
    %52 = arith.addf %47, %51 : vector<8x128xf32>
    %cst_28 = arith.constant 0.797884583 : f32
    %53 = vector.broadcast %cst_28 : f32 to vector<8x128xf32>
    %54 = arith.mulf %53, %52 : vector<8x128xf32>
    %55 = math.tanh %54 : vector<8x128xf32>
    %cst_29 = arith.constant 1.000000e+00 : f32
    %56 = vector.broadcast %cst_29 : f32 to vector<8x128xf32>
    %57 = arith.addf %56, %55 : vector<8x128xf32>
    %cst_30 = arith.constant 5.000000e-01 : f32
    %58 = vector.broadcast %cst_30 : f32 to vector<8x128xf32>
    %59 = arith.mulf %58, %57 : vector<8x128xf32>
    %60 = arith.mulf %47, %59 : vector<8x128xf32>
    %c0_31 = arith.constant 0 : index
    %c0_32 = arith.constant 0 : index
    %61 = vector.load %arg11[%c0_31, %c0_32] : memref<128x32xf32, #tpu.memory_space<vmem>>, vector<128x32xf32>
    %cst_33 = arith.constant dense<0.000000e+00> : vector<8x32xf32>
    %62 = tpu.matmul %60, %61, %cst_33 {dimension_numbers = #tpu.dot_dimension_numbers<[1], [0], [0], [1], [0, 0, 1, 1], [], []>} : vector<8x128xf32>, vector<128x32xf32>, vector<8x32xf32> -> vector<8x32xf32>
    %63 = arith.addf %42, %62 : vector<8x32xf32>
    %c0_34 = arith.constant 0 : index
    %c0_35 = arith.constant 0 : index
    %64 = vector.load %arg12[%c0_34, %c0_35] : memref<1x32xf32, #tpu.memory_space<vmem>>, vector<1x32xf32>
    %65 = vector.broadcast %64 : vector<1x32xf32> to vector<8x32xf32>
    %66 = arith.addf %63, %65 : vector<8x32xf32>
    %c0_36 = arith.constant 0 : index
    %c0_37 = arith.constant 0 : index
    %c0_38 = arith.constant 0 : index
    %67 = vector.load %arg14[%c0_36, %c0_37, %c0_38] : memref<1x8x32xf32, #tpu.memory_space<vmem>>, vector<1x8x32xf32>
    %68 = vector.shape_cast %67 : vector<1x8x32xf32> to vector<8x32xf32>
    %69 = vector.shape_cast %66 : vector<8x32xf32> to vector<1x8x32xf32>
    tpu.vector_store %arg14[%c0_36, %c0_37, %c0_38], %69 {strides = array<i32>} : memref<1x8x32xf32, #tpu.memory_space<vmem>>, vector<1x8x32xf32>,
    %70 = tpu.iota {dimensions = array<i32: 0>} : vector<8x1xi32>
    %71 = vector.broadcast %1 : i32 to vector<8x1xi32>
    %72 = arith.cmpi slt, %70, %71 : vector<8x1xi32>
    %73 = arith.extui %72 : vector<8x1xi1> to vector<8x1xi32>
    %74 = arith.sitofp %73 : vector<8x1xi32> to vector<8x1xf32>
    %cst_39 = arith.constant dense<0.000000e+00> : vector<1xf32>
    %75 = vector.multi_reduction <add>, %74, %cst_39 [0] : vector<8x1xf32> to vector<1xf32>
    %76 = vector.shape_cast %75 : vector<1xf32> to vector<1x1xf32>
    %cst_40 = arith.constant 1.000000e+00 : f32
    %77 = vector.broadcast %cst_40 : f32 to vector<1x1xf32>
    %78 = arith.maximumf %76, %77 : vector<1x1xf32>
    %79 = vector.broadcast %74 : vector<8x1xf32> to vector<8x32xf32>
    %80 = arith.mulf %66, %79 : vector<8x32xf32>
    %cst_41 = arith.constant dense<0.000000e+00> : vector<32xf32>
    %81 = vector.multi_reduction <add>, %80, %cst_41 [0] : vector<8x32xf32> to vector<32xf32>
    %82 = vector.shape_cast %81 : vector<32xf32> to vector<1x32xf32>
    %83 = vector.broadcast %78 : vector<1x1xf32> to vector<1x32xf32>
    %84 = arith.divf %82, %83 : vector<1x32xf32>
    %c0_42 = arith.constant 0 : index
    %c0_43 = arith.constant 0 : index
    %c0_44 = arith.constant 0 : index
    %85 = vector.load %arg13[%c0_42, %c0_43, %c0_44] : memref<1x1x32xf32, #tpu.memory_space<vmem>>, vector<1x1x32xf32>
    %86 = vector.shape_cast %85 : vector<1x1x32xf32> to vector<1x32xf32>
    %87 = vector.shape_cast %84 : vector<1x32xf32> to vector<1x1x32xf32>
    tpu.vector_store %arg13[%c0_42, %c0_43, %c0_44], %87 {strides = array<i32>} : memref<1x1x32xf32, #tpu.memory_space<vmem>>, vector<1x1x32xf32>,
    return
  }
  func.func @transform_0(%arg0: i32, %arg1: memref<2xi32, #tpu.memory_space<smem>>) -> (i32, i32, i32) {
    %c0_i32 = arith.constant 0 : i32
    %c0_i32_0 = arith.constant 0 : i32
    %c0_i32_1 = arith.constant 0 : i32
    return %arg0, %c0_i32, %c0_i32_0 : i32, i32, i32
  }
  func.func @transform_1(%arg0: i32, %arg1: memref<2xi32, #tpu.memory_space<smem>>) -> (i32, i32) {
    %c0_i32 = arith.constant 0 : i32
    %c0_i32_0 = arith.constant 0 : i32
    %c0_i32_1 = arith.constant 0 : i32
    return %c0_i32, %c0_i32_0 : i32, i32
  }
  func.func @transform_2(%arg0: i32, %arg1: memref<2xi32, #tpu.memory_space<smem>>) -> (i32, i32) {
    %c0_i32 = arith.constant 0 : i32
    %c0_i32_0 = arith.constant 0 : i32
    %c0_i32_1 = arith.constant 0 : i32
    return %c0_i32, %c0_i32_0 : i32, i32
  }
  func.func @transform_3(%arg0: i32, %arg1: memref<2xi32, #tpu.memory_space<smem>>) -> (i32, i32) {
    %c0_i32 = arith.constant 0 : i32
    %c0_i32_0 = arith.constant 0 : i32
    %c0_i32_1 = arith.constant 0 : i32
    return %c0_i32, %c0_i32_0 : i32, i32
  }
  func.func @transform_4(%arg0: i32, %arg1: memref<2xi32, #tpu.memory_space<smem>>) -> (i32, i32) {
    %c0_i32 = arith.constant 0 : i32
    %c0_i32_0 = arith.constant 0 : i32
    %c0_i32_1 = arith.constant 0 : i32
    return %c0_i32, %c0_i32_0 : i32, i32
  }
  func.func @transform_5(%arg0: i32, %arg1: memref<2xi32, #tpu.memory_space<smem>>) -> (i32, i32) {
    %c0_i32 = arith.constant 0 : i32
    %c0_i32_0 = arith.constant 0 : i32
    %c0_i32_1 = arith.constant 0 : i32
    return %c0_i32, %c0_i32_0 : i32, i32
  }
  func.func @transform_6(%arg0: i32, %arg1: memref<2xi32, #tpu.memory_space<smem>>) -> (i32, i32) {
    %c0_i32 = arith.constant 0 : i32
    %c0_i32_0 = arith.constant 0 : i32
    %c0_i32_1 = arith.constant 0 : i32
    return %c0_i32, %c0_i32_0 : i32, i32
  }
  func.func @transform_7(%arg0: i32, %arg1: memref<2xi32, #tpu.memory_space<smem>>) -> (i32, i32) {
    %c0_i32 = arith.constant 0 : i32
    %c0_i32_0 = arith.constant 0 : i32
    %c0_i32_1 = arith.constant 0 : i32
    return %c0_i32, %c0_i32_0 : i32, i32
  }
  func.func @transform_8(%arg0: i32, %arg1: memref<2xi32, #tpu.memory_space<smem>>) -> (i32, i32) {
    %c0_i32 = arith.constant 0 : i32
    %c0_i32_0 = arith.constant 0 : i32
    %c0_i32_1 = arith.constant 0 : i32
    return %c0_i32, %c0_i32_0 : i32, i32
  }
  func.func @transform_9(%arg0: i32, %arg1: memref<2xi32, #tpu.memory_space<smem>>) -> (i32, i32) {
    %c0_i32 = arith.constant 0 : i32
    %c0_i32_0 = arith.constant 0 : i32
    %c0_i32_1 = arith.constant 0 : i32
    return %c0_i32, %c0_i32_0 : i32, i32
  }
  func.func @transform_10(%arg0: i32, %arg1: memref<2xi32, #tpu.memory_space<smem>>) -> (i32, i32) {
    %c0_i32 = arith.constant 0 : i32
    %c0_i32_0 = arith.constant 0 : i32
    %c0_i32_1 = arith.constant 0 : i32
    return %c0_i32, %c0_i32_0 : i32, i32
  }
  func.func @transform_11(%arg0: i32, %arg1: memref<2xi32, #tpu.memory_space<smem>>) -> (i32, i32, i32) {
    %c0_i32 = arith.constant 0 : i32
    %c0_i32_0 = arith.constant 0 : i32
    %c0_i32_1 = arith.constant 0 : i32
    return %arg0, %c0_i32, %c0_i32_0 : i32, i32, i32
  }
  func.func @transform_12(%arg0: i32, %arg1: memref<2xi32, #tpu.memory_space<smem>>) -> (i32, i32, i32) {
    %c0_i32 = arith.constant 0 : i32
    %c0_i32_0 = arith.constant 0 : i32
    %c0_i32_1 = arith.constant 0 : i32
    return %arg0, %c0_i32, %c0_i32_0 : i32, i32, i32
  }
}

</mosaic_0001>

<bundles_post_ra>
// kernel: tpu_custom_call.1
= control target key start
LH: loop header
LB: loop body
LE: loop exit
PB: predicated region body
PF: predicated region fallthrough
CT: control target
= control target key end

     0   :  { %s1889_s0 = inlined_call_operand.vmem [shape: s32[2], index: 0, kind: input, shape index: {}]   ;;  %s1890_s1 = inlined_call_operand.vmem [shape: f32[2,8,32], index: 1, kind: input, shape index: {}]   ;;  %s1891_s2 = inlined_call_operand.vmem [shape: f32[32,32], index: 2, kind: input, shape index: {}]   ;;  %s1892_s3 = inlined_call_operand.vmem [shape: f32[1,32], index: 3, kind: input, shape index: {}]   ;;  %s1893_s4 = inlined_call_operand.vmem [shape: f32[32,96], index: 4, kind: input, shape index: {}]   ;;  %s1894_s5 = inlined_call_operand.vmem [shape: f32[1,96], index: 5, kind: input, shape index: {}]   ;;  %s1895_s6 = inlined_call_operand.vmem [shape: f32[32,32], index: 6, kind: input, shape index: {}]   ;;  %s1896_s7 = inlined_call_operand.vmem [shape: f32[1,32], index: 7, kind: input, shape index: {}]   ;;  %s1897_s8 = inlined_call_operand.vmem [shape: f32[32,128], index: 8, kind: input, shape index: {}]   ;;  %s1898_s9 = inlined_call_operand.vmem [shape: f32[1,128], index: 9, kind: input, shape index: {}]   ;;  %s1899_s10 = inlined_call_operand.vmem [shape: f32[128,32], index: 10, kind: input, shape index: {}]   ;;  %s1900_s11 = inlined_call_operand.vmem [shape: f32[1,32], index: 11, kind: input, shape index: {}]   ;;  %s1901_s12 = inlined_call_operand.hbm [shape: f32[2,1,32], index: 12, kind: output, shape index: {0}]   ;;  %s1902_s13 = inlined_call_operand.hbm [shape: f32[2,8,32], index: 13, kind: output, shape index: {1}]  }
   0x1   :  { %1903 = sst [smem:[#allocation11_spill]] %s1890_s1  ;;  %s19_s27 = sshll.u32 %s1889_s0, 4  ;;  %s20_s27 = int_to_ptr.vmem [resolvable:$true] %s19_s27 }
   0x2   :  { %1904 = sst [smem:[#allocation12_spill]] %s1891_s2  ;;  %s1396_s28 = scalar_lea.vmem %s20_s27, 16 }
   0x3   :  { %1905 = sst [smem:[#allocation13_spill]] %s1892_s3  ;;  %p1397_p0 = scmp.ne.s32.totalorder %s20_s27, %s1396_s28 }
   0x4   :  { %1906 = sst [smem:[#allocation14_spill]] %s1893_s4  ;;  %p1401_p1 = scmp.lt.s32.totalorder %s20_s27, %s20_s27 }
   0x5   :  { %p1402_p2 = scmp.lt.s32.totalorder %s1396_s28, %s1396_s28 }
   0x7   :  { %p1403_p3 = por %p1402_p2, %p1401_p1 }
   0x9   :  { %p1404_p4 = pnand %p1403_p3, %p1397_p0 }
   0xb   :  { %1407 = shalt.err (!%p1404_p4)  }
   0xc   :  { %s1502_s29 = smov [#allocation3]  }
   0xd   :  { %22 = dma.vmem_to_smem %s20_s27, 16, %s1502_s29, [#allocation2] }
   0xe   :  { %1476 = dma.done.wait [#allocation2], 16 }
   0xf   :  { %1477 = vsyncadd [#allocation2], 4294967280 }
  0x10   :  { %24 = sfence }
  0x11   :  { %25 = vsyncpa [#allocation5], 0 }
  0x12   :  { %27 = vsyncpa [#allocation5 + $0x1], 0 }
  0x13   :  { %28 = vsyncpa [#allocation7], 0 }
  0x14   :  { %30 = vsyncpa [#allocation7 + $0x1], 0  ;;  %s1582_s30 = smov 0   ;;  %s1584_s0 = smov 0  }
  0x15   :  { %s1586_s14 = smov 0   ;;  %s1588_s15 = smov 0  }
  0x16 LB: > { %s1603_s16 = sadd.s32 4294967295, %s1500_s15   ;;  %s1185_s17 = sadd.s32 4294967294, %s1500_s15   ;;  %s1500_s15 = sphi %s1588_s15, %s1918_s15   ;;  %s1496_s14 = sphi %s1586_s14, %s1917_s14   ;;  %s1492_s0 = sphi %s1584_s0, %s1916_s0   ;;  %s1488_s30 = sphi %s1582_s30, %s1915_s30  }
  0x17   : > { %s1607_s18 = sadd.s32 1, %s1500_s15   ;;  %s279_s19 = sadd.s32 1, %s1496_s14 }
  0x18   : > { %s276_s20 = ssub.s32 %s1500_s15, %s1607_s18  ;;  %p289_p5 = scmp.ne.s32.totalorder %s1496_s14, %s1492_s0 }
  0x19   : > { %p277_p6 = scmp.eq.s32.totalorder %s276_s20, 0  ;;  %p290_p7 = scmp.eq.s32.totalorder %s1603_s16, 1 }
  0x1a   : > { %p295_p8 = scmp.ne.s32.totalorder %s1492_s0, %s1488_s30  ;;  %p296_p9 = scmp.eq.s32.totalorder %s1185_s17, 1 }
  0x1b   : > { %s1618_s21 = scalar_select %p277_p6, %s1496_s14, %s279_s19  }
  0x1c   : > { %p1620_p10 = por %p290_p7, %p289_p5  ;;  %p1624_p11 = por %p296_p9, %p295_p8 }
  0x1d   : > { %p1188_p12 = scmp.ge.s32.totalorder %s1500_s15, 1  ;;  %p377_p13 = scmp.lt.s32.totalorder %s1500_s15, 3 }
  0x1f   : > { %p378_p0 = pnand %p1188_p12, %p377_p13 }
  0x20   : > { %s1909_s2 = sld [smem:[#allocation12_spill]] (!%p378_p0)  ;;  %p422_p1 = scmp.lt.s32.totalorder (!%p378_p0), %s1603_s16, 1 }
  0x21   : > { %381 = sbr.rel (%p378_p0) target bundleno = 1915 (0x77b), region = 64  ;;  %s1910_s1 = sld [smem:[#allocation11_spill]] (!%p378_p0) }
  0x22   : > { %s1911_s4 = sld [smem:[#allocation14_spill]] (!%p378_p0)  ;;  %s1505_s20 = smov (!%p378_p0), 96  }
  0x23   : > { %s1912_s3 = sld [smem:[#allocation13_spill]] (!%p378_p0)  ;;  %s1506_s24 = smov (!%p378_p0), 64  }
  0x24   : > { %s1507_s26 = smov (!%p378_p0), [#allocation6]  }
  0x26   : > { %v431_v0 = vld [vmem:[%s1909_s2 + $0x18] sm:$0xff]  ;;  %v1503_v1 = vmov 0.0   ;;  %v430_v2 = vld [vmem:[%s1909_s2 + $0x10] sm:$0xff]  ;;  %vm1504_vm0 = vmmov 0   ;;  %s423_s28 = scalar_select %p422_p1, %s1603_s16, 1  ;;  %v429_v3 = vld [vmem:[%s1909_s2 + $0x8] sm:$0xff]  ;;  %v675_v19 = vlaneseq }
  0x27   : > { %1250 = vmatprep.subr.mxu1 %v1503_v1  ;;  %1258 = vmatprep.mubr.msk.f32.mxu1 %vm1504_vm0, %v1503_v1  ;;  %v428_v4 = vld [vmem:[%s1909_s2] sm:$0xff]  ;;  %vm439_vm1 = vcmask 261120   ;;  %vm680_vm4 = vcmask 64512   ;;  %v771_v38 = vld [vmem:[%s1895_s6 + $0x18] sm:$0xff]  ;;  %v770_v39 = vld [vmem:[%s1895_s6 + $0x10] sm:$0xff]  ;;  %s1412_s2 = sshll.u32 %s1507_s26, 4  ;;  %s1413_s2 = int_to_ptr.vmem [resolvable:$false] %s1412_s2 }
  0x28   : > { %1251 = vmatpush3.msra.mxu1 %v431_v0  ;;  %1272 = vmatprep.subr.mxu0 %v1503_v1  ;;  %s1190_s19 = sshll.u32 %s423_s28, 3  ;;  %v516_v6 = vld [vmem:[%s1911_s4 + $0x18] sm:$0xff]  ;;  %v515_v7 = vld [vmem:[%s1911_s4 + $0x10] sm:$0xff]  ;;  %v514_v8 = vld [vmem:[%s1911_s4 + $0x8] sm:$0xff]  ;;  %v1044_v20 = vshrl.u32 %v675_v19, 7  ;;  %v676_v23 = vand.u32 127, %v675_v19 }
  0x29   : > { %1252 = vmatprep.subr.mxu1 %v1503_v1  ;;  %1274 = vmatprep.mubr.msk.f32.mxu0 %vm1504_vm0, %v1503_v1  ;;  %s425_s27 = scalar_lea.vmem %s1910_s1, %s1190_s19  ;;  %v513_v9 = vld [vmem:[%s1911_s4] sm:$0xff]  ;;  %s426_s19 = sld [smem:[#allocation3 + %s1603_s16]]  ;;  %v769_v40 = vld [vmem:[%s1895_s6 + $0x8] sm:$0xff]  ;;  %v857_v42 = vld [vmem:[%s1897_s8 + $0x18] sm:$0xff] }
  0x2a   : > { %1253 = vmatpush3.msra.mxu1 %v430_v2  ;;  %v427_v5 = vld [vmem:[%s425_s27] sm:$0xff]  ;;  %v856_v45 = vld [vmem:[%s1897_s8 + $0x10] sm:$0xff]  ;;  %v855_v46 = vld [vmem:[%s1897_s8 + $0x8] sm:$0xff]  ;;  %s1206_s27 = sshll.u32 %s1603_s16, 7 }
  0x2b   : > { %1254 = vmatprep.subr.mxu1 %v1503_v1  ;;  %v1191_v10 = vld [vmem:[%s1912_s3] ss:$0 sm:$0xff]  ;;  %v962_v53 = vld [vmem:[%s1899_s10 + $0x78] sm:$0xff]  ;;  %v961_v54 = vld [vmem:[%s1899_s10 + $0x70] sm:$0xff]  ;;  %s1827_s1 = scalar_lea.hbm %s1902_s13, %s1206_s27  ;;  %s1414_s27 = scalar_lea.vmem %s1413_s2, 256 }
  0x2c   : > { %1255 = vmatpush3.msra.mxu1 %v429_v3  ;;  %v1193_v14 = vld [vmem:[%s1894_s5] ss:$0 sm:$0xff]  ;;  %v960_v55 = vld [vmem:[%s1899_s10 + $0x68] sm:$0xff]  ;;  %v958_v57 = vld [vmem:[%s1899_s10 + $0x58] sm:$0xff] }
  0x2d   : > { %1256 = vmatprep.subr.mxu1 %v1503_v1  ;;  %v768_v41 = vld [vmem:[%s1895_s6] sm:$0xff]  ;;  %v957_v58 = vld [vmem:[%s1899_s10 + $0x50] sm:$0xff]  ;;  %v956_v59 = vld [vmem:[%s1899_s10 + $0x48] sm:$0xff] }
  0x2e   : > { %1257 = vmatpush3.msra.mxu1 %v428_v4  ;;  %v854_v47 = vld [vmem:[%s1897_s8] sm:$0xff]  ;;  %v954_v61 = vld [vmem:[%s1899_s10 + $0x38] sm:$0xff]  ;;  %v953_v62 = vld [vmem:[%s1899_s10 + $0x30] sm:$0xff] }
  0x2f   : > { %1259 = vmatmul.mubr.msk.f32.vlgmr.msra.gmra.mxu1 %vm439_vm1, %v427_v5  ;;  %1261 = vmatprep.subr.mxu1 %v1503_v1  ;;  %v677_v21 = vstv %s426_s19  ;;  %v1199_v49 = vld [vmem:[%s1896_s7] ss:$0 sm:$0xff]  ;;  %v952_v63 = vld [vmem:[%s1899_s10 + $0x28] sm:$0xff]  ;;  %v950_v2 = vld [vmem:[%s1899_s10 + $0x18] sm:$0xff]  ;;  %s1816_s19 = sand.u32 1, %s1492_s0  }
  0x30   : > { %1262 = vmatpush3.msra.mxu1 %v516_v6  ;;  %1269 = vmatprep.mubr.msk.f32.mxu1 %vm1504_vm0, %v1503_v1  ;;  %vm1694_vm2 = vcmp.lt.s32.totalorder %v1044_v20, %v677_v21  ;;  %vm678_vm3 = vcmp.ge.s32.totalorder %v676_v23, %v677_v21  ;;  %v959_v56 = vld [vmem:[%s1899_s10 + $0x60] sm:$0xff]  ;;  %v949_v3 = vld [vmem:[%s1899_s10 + $0x10] sm:$0xff]  ;;  %v948_v4 = vld [vmem:[%s1899_s10 + $0x8] sm:$0xff] }
  0x31   : > { %1263 = vmatprep.subr.mxu1 %v1503_v1  ;;  %v955_v60 = vld [vmem:[%s1899_s10 + $0x40] sm:$0xff]  ;;  %v1203_v19 = vsel %vm1694_vm2, 1.0, %v1503_v1 }
  0x32   : > { %1264 = vmatpush3.msra.mxu1 %v515_v7  ;;  %v951_v0 = vld [vmem:[%s1899_s10 + $0x20] sm:$0xff]  ;;  %v1048_v20 = vrot.slane %v1203_v19, 4 }
  0x33   : > { %1265 = vmatprep.subr.mxu1 %v1503_v1  ;;  %v947_v5 = vld [vmem:[%s1899_s10] sm:$0xff] }
  0x34   : > { %1266 = vmatpush3.msra.mxu1 %v514_v8  ;;  %v1200_v6 = vld [vmem:[%s1898_s9] ss:$0 sm:$0xff]  ;;  %v1049_v21 = vadd.f32 %v1203_v19, %v1048_v20 }
  0x35   : > { %1267 = vmatprep.subr.mxu1 %v1503_v1 }
  0x36   : > { %1268 = vmatpush3.msra.mxu1 %v513_v9  ;;  %v1050_v23 = vrot.slane %v1049_v21, 2 }
  0x37   : > { %1277 = vmatprep.subr.mxu1 %v1503_v1 }
  0xef   : > { %v509_v11 = vpop.f32.mrf.mxu1 }
  0xf0   : > { %v1679_v12 = vadd.f32 %v1191_v10, %v509_v11 }
  0xf1   : > { %v1260_v13 = vpop.f32.mrf.mxu1 }
  0xf2   : > { %1270 = vmatmul.mubr.msk.f32.vlgmr.msra.gmra.mxu1 %vm439_vm1, %v1679_v12 }
  0xf3   : > { %1279 = vmatprep.mubr.msk.f32.mxu1 %vm1504_vm0, %v1503_v1 }
 0x1b2   : > { %v593_v15 = vpop.f32.mrf.mxu1 }
 0x1b3   : > { %v594_v16 = vadd.f32 %v1193_v14, %v593_v15 }
 0x1b4   : > { %v1271_v17 = vpop.f32.mrf.mxu1 }
 0x1b5   : > { %598 = vrot.lane.b32.xlu0 %v594_v16, %s1505_s20 }
 0x227   : > { %v599_v18 = vpop.permute.xlu0 %598 }
 0x228   : > { %1273 = vmatpush3.xpose.msk.msra.mxu0 %vm439_vm1, %v599_v18 }
 0x229   : > { %1304 = vmatprep.subr.mxu0 %v1503_v1 }
 0x22b   : > { %1275 = vmatmul.mubr.msk.f32.vlgmr.msra.gmra.mxu0 %vm439_vm1, %v594_v16 }
 0x22c   : > { %1336 = vmatprep.mubr.msk.f32.mxu0 %vm1504_vm0, %v1503_v1  ;;  %1305 = vmatpush3.msra.mxu0 %v962_v53 }
 0x22d   : > { %1306 = vmatprep.subr.mxu0 %v1503_v1 }
 0x22e   : > { %1307 = vmatpush3.msra.mxu0 %v961_v54 }
 0x22f   : > { %1308 = vmatprep.subr.mxu0 %v1503_v1 }
 0x230   : > { %1309 = vmatpush3.msra.mxu0 %v960_v55 }
 0x231   : > { %1310 = vmatprep.subr.mxu0 %v1503_v1 }
 0x232   : > { %1311 = vmatpush3.msra.mxu0 %v959_v56 }
 0x233   : > { %1312 = vmatprep.subr.mxu0 %v1503_v1 }
 0x234   : > { %1313 = vmatpush3.msra.mxu0 %v958_v57 }
 0x235   : > { %1314 = vmatprep.subr.mxu0 %v1503_v1 }
 0x236   : > { %1315 = vmatpush3.msra.mxu0 %v957_v58 }
 0x237   : > { %1316 = vmatprep.subr.mxu0 %v1503_v1 }
 0x238   : > { %1317 = vmatpush3.msra.mxu0 %v956_v59 }
 0x239   : > { %1318 = vmatprep.subr.mxu0 %v1503_v1 }
 0x23a   : > { %1319 = vmatpush3.msra.mxu0 %v955_v60 }
 0x23b   : > { %1320 = vmatprep.subr.mxu0 %v1503_v1 }
 0x23c   : > { %1321 = vmatpush3.msra.mxu0 %v954_v61 }
 0x23d   : > { %1322 = vmatprep.subr.mxu0 %v1503_v1 }
 0x23e   : > { %1323 = vmatpush3.msra.mxu0 %v953_v62 }
 0x23f   : > { %1324 = vmatprep.subr.mxu0 %v1503_v1 }
 0x240   : > { %1325 = vmatpush3.msra.mxu0 %v952_v63 }
 0x241   : > { %1326 = vmatprep.subr.mxu0 %v1503_v1 }
 0x242   : > { %1327 = vmatpush3.msra.mxu0 %v951_v0 }
 0x243   : > { %1328 = vmatprep.subr.mxu0 %v1503_v1 }
 0x244   : > { %1329 = vmatpush3.msra.mxu0 %v950_v2 }
 0x245   : > { %1330 = vmatprep.subr.mxu0 %v1503_v1 }
 0x246   : > { %1331 = vmatpush3.msra.mxu0 %v949_v3 }
 0x247   : > { %1332 = vmatprep.subr.mxu0 %v1503_v1 }
 0x248   : > { %1333 = vmatpush3.msra.mxu0 %v948_v4 }
 0x249   : > { %1334 = vmatprep.subr.mxu0 %v1503_v1 }
 0x24a   : > { %1335 = vmatpush3.msra.mxu0 %v947_v5 }
 0x2eb   : > { %v670_v24 = vpop.f32.mrf.mxu0 }
 0x2ec   : > { %v674_v25 = vmul.f32 0.17677669, %v670_v24  ;;  %v1051_v24 = vadd.f32 %v1050_v23, %v1049_v21 }
 0x2ed   : > { %v1276_v26 = vpop.f32.mrf.mxu0 }
 0x2ee   : > { %v679_v27 = vsel %vm678_vm3, -1e+18, %v674_v25  ;;  %v1052_v25 = vrot.slane %v1051_v24, 1 }
 0x2ef   : > { %v681_v28 = vsel %vm680_vm4, %v679_v27, -inf }
 0x2f0   : > { %682 = vmax.xlane.f32.xlu0 %v681_v28  ;;  %v1053_v26 = vadd.f32 %v1052_v25, %v1051_v24 }
 0x379   : > { %v683_v29 = vpop.xlane.xlu0 %682 }
 0x37a   : > { %v684_v30 = vsub.f32 %v679_v27, %v683_v29  ;;  %v1054_v27 = vmax.f32 %v1053_v26, 1.0  ;;  %v1202_v29 = vld [vmem:[%s1900_s11] ss:$0 sm:$0xff] }
 0x37c   : > { %v685_v31 = vmul.f32 1.442695, %v684_v30 }
 0x37e   : > { %1388 = vpow2.f32 %v685_v31 }
 0x38b   : > { %v1389_v32 = vpop.eup %1388 }
 0x38c   : > { %v687_v33 = vsel %vm680_vm4, %v1389_v32, 0.0 }
 0x38d   : > { %688 = vadd.xlane.f32.xlu1 %v687_v33 }
 0x39e   : > { %692 = vrot.lane.b32.xlu1 %v594_v16, %s1506_s24  ;;  %s1189_s24 = sshll.u32 %s1816_s19, 3 }
 0x39f   : > { %s421_s29 = scalar_lea.vmem [#allocation6], %s1189_s24  ;;  %s1072_s24 = scalar_lea.sflag [#allocation7], %s1816_s19 }
 0x3a0   : > { %s1098_s17 = sshll.u32 %s421_s29, 4  ;;  %s1829_s17 = int_to_ptr.vmem [resolvable:$true] %s1098_s17 }
 0x3a1   : > { %s1408_s25 = scalar_lea.vmem %s1829_s17, 128  ;;  %p1415_p5 = scmp.lt.s32.totalorder %s1829_s17, %s1413_s2 }
 0x3a2   : > { %p1409_p2 = scmp.ne.s32.totalorder %s1829_s17, %s1408_s25  ;;  %p1416_p6 = scmp.lt.s32.totalorder %s1414_s27, %s1408_s25 }
 0x3a4   : > { %p1410_p3 = pnand %p1409_p2, %p1620_p10  ;;  %p1417_p7 = por %p1416_p6, %p1415_p5 }
 0x3a6   : > { %p1411_p4 = pneg %p1410_p3 }
 0x3a8   : > { %p1418_p8 = pnand %p1417_p7, %p1411_p4 }
 0x416   : > { %v689_v34 = vpop.xlane.xlu1 %688 }
 0x417   : > { %1390 = vrcp.f32 %v689_v34 }
 0x41a   : > { %v693_v35 = vpop.permute.xlu1 %692 }
 0x41b   : > { %1278 = vmatpush3.msra.mxu1 %v693_v35 }
 0x41c   : > { %1282 = vmatprep.subr.mxu1 %v1503_v1 }
 0x424   : > { %v1391_v36 = vpop.eup %1390 }
 0x425   : > { %v691_v37 = vmul.f32 %v1391_v36, %v1389_v32 }
 0x427   : > { %1280 = vmatmul.mubr.msk.f32.vlgmr.msra.gmra.mxu1 %vm680_vm4, %v691_v37 }
 0x428   : > { %1283 = vmatpush3.msra.mxu1 %v771_v38  ;;  %1290 = vmatprep.mubr.msk.f32.mxu1 %vm1504_vm0, %v1503_v1 }
 0x429   : > { %1284 = vmatprep.subr.mxu1 %v1503_v1 }
 0x42a   : > { %1285 = vmatpush3.msra.mxu1 %v770_v39 }
 0x42b   : > { %1286 = vmatprep.subr.mxu1 %v1503_v1 }
 0x42c   : > { %1287 = vmatpush3.msra.mxu1 %v769_v40 }
 0x42d   : > { %1288 = vmatprep.subr.mxu1 %v1503_v1 }
 0x42e   : > { %1289 = vmatpush3.msra.mxu1 %v768_v41 }
 0x42f   : > { %1293 = vmatprep.subr.mxu1 %v1503_v1 }
 0x4e7   : > { %v764_v43 = vpop.f32.mrf.mxu1 }
 0x4e8   : > { %1291 = vmatmul.mubr.msk.f32.vlgmr.msra.gmra.mxu1 %vm439_vm1, %v764_v43 }
 0x4e9   : > { %v1281_v44 = vpop.f32.mrf.mxu1  ;;  %1294 = vmatpush3.msra.mxu1 %v857_v42  ;;  %1301 = vmatprep.mubr.msk.f32.mxu1 %vm1504_vm0, %v1503_v1 }
 0x4ea   : > { %1295 = vmatprep.subr.mxu1 %v1503_v1 }
 0x4eb   : > { %1296 = vmatpush3.msra.mxu1 %v856_v45 }
 0x4ec   : > { %1297 = vmatprep.subr.mxu1 %v1503_v1 }
 0x4ed   : > { %1298 = vmatpush3.msra.mxu1 %v855_v46 }
 0x4ee   : > { %1299 = vmatprep.subr.mxu1 %v1503_v1 }
 0x4ef   : > { %1300 = vmatpush3.msra.mxu1 %v854_v47 }
 0x5a8   : > { %v841_v48 = vpop.f32.mrf.mxu1 }
 0x5a9   : > { %v845_v50 = vadd.f32 %v841_v48, %v1679_v12 }
 0x5aa   : > { %v1292_v51 = vpop.f32.mrf.mxu1 }
 0x5ab   : > { %v1742_v52 = vadd.f32 %v1199_v49, %v845_v50 }
 0x5ad   : > { %1302 = vmatmul.mubr.msk.f32.vlgmr.msra.gmra.mxu1 %vm439_vm1, %v1742_v52 }
 0x66d   : > { %v934_v7 = vpop.f32.mrf.mxu1 }
 0x66e   : > { %v935_v8 = vadd.f32 %v1200_v6, %v934_v7 }
 0x66f   : > { %v1303_v9 = vpop.f32.mrf.mxu1 }
 0x670   : > { %v938_v10 = vmul.f32 %v935_v8, %v935_v8 }
 0x672   : > { %v939_v11 = vmul.f32 %v938_v10, %v935_v8 }
 0x674   : > { %v940_v12 = vmul.f32 0.044715, %v939_v11 }
 0x676   : > { %v941_v13 = vadd.f32 %v940_v12, %v935_v8 }
 0x678   : > { %v942_v14 = vmul.f32 0.7978846, %v941_v13 }
 0x67a   : > { %1392 = vtanh.f32 %v942_v14 }
 0x67b   : > { %1394 = vrcp.f32 %v1054_v27 }
 0x687   : > { %v1393_v15 = vpop.eup %1392 }
 0x688   : > { %v944_v16 = vadd.f32 1.0, %v1393_v15 }
 0x68a   : > { %v945_v17 = vmul.f32 0.5, %v944_v16 }
 0x68c   : > { %v946_v18 = vmul.f32 %v945_v17, %v935_v8 }
 0x68e   : > { %1337 = vmatmul.mubr.f32.vlgmr.msra.gmra.mxu0 %v946_v18 }
 0x74e   : > { %v1029_v28 = vpop.f32.mrf.mxu0 }
 0x74f   : > { %v1033_v1 = vadd.f32 %v1029_v28, %v1742_v52 }
 0x750   : > { %v1338_v22 = vpop.f32.mrf.mxu0 }
 0x751   : > { %v1041_v30 = vadd.f32 %v1202_v29, %v1033_v1 }
 0x753   : > { %v1055_v31 = vmul.f32 %v1203_v19, %v1041_v30  ;;  %1042 = vst.msk [vmem:[%s421_s29] sm:$0xff] %vm439_vm1, %v1041_v30 }
 0x754   : > { %1421 = shalt.err (!%p1418_p8)
}
 0x755   : > { %s1422_s29 = scalar_lea.hbm %s1827_s1, 128  ;;  %s1426_s26 = scalar_lea.hbm %s1902_s13, 256 }
 0x756   : > { %p1423_p9 = scmp.ne.s32.totalorder %s1827_s1, %s1422_s29  ;;  %p1427_p0 = scmp.lt.s32.totalorder %s1827_s1, %s1902_s13 }
 0x757   : > { %p1428_p1 = scmp.lt.s32.totalorder %s1426_s26, %s1422_s29 }
 0x758   : > { %p1424_p12 = pnand %p1423_p9, %p1620_p10 }
 0x759   : > { %p1429_p2 = por %p1428_p1, %p1427_p0 }
 0x75a   : > { %p1425_p13 = pneg %p1424_p12 }
 0x75c   : > { %p1430_p3 = pnand %p1429_p2, %p1425_p13 }
 0x75e   : > { %1433 = shalt.err (!%p1430_p3)
}
 0x75f   : > { %1340 = dma.vmem_to_hbm [thread:$0]  (%p1620_p10), %s1829_s17, 128, %s1827_s1, %s1072_s24   ;;  %v1056_v32 = vsel %vm439_vm1, %v1055_v31, 0.0  ;;  %v1395_v38 = vpop.eup %1394  ;;  %vm1065_vm5 = vcmask 253952  }
 0x760   : > { %v1057_v33 = vrot.slane %v1056_v32, 4  ;;  %s1205_s2 = sshll.u32 %s1603_s16, 4  ;;  %s414_s3 = scalar_lea.vmem [#allocation4], %s1816_s19 }
 0x761   : > { %s1085_s4 = sshll.u32 %s414_s3, 4  ;;  %s1083_s1 = scalar_lea.hbm %s1901_s12, %s1205_s2  ;;  %s1086_s4 = int_to_ptr.vmem [resolvable:$true] %s1085_s4 }
 0x762   : > { %v1058_v34 = vadd.f32 %v1057_v33, %v1056_v32  ;;  %s1068_s17 = scalar_lea.sflag [#allocation5], %s1816_s19  ;;  %s1434_s24 = scalar_lea.vmem %s1086_s4, 16 }
 0x763   : > { %p1435_p4 = scmp.ne.s32.totalorder %s1086_s4, %s1434_s24  ;;  %s1508_s29 = smov [#allocation4]  }
 0x764   : > { %v1059_v35 = vrot.slane %v1058_v34, 2  ;;  %s1438_s28 = sshll.u32 %s1508_s29, 4  ;;  %s1439_s28 = int_to_ptr.vmem [resolvable:$false] %s1438_s28 }
 0x765   : > { %p1436_p5 = pnand %p1435_p4, %p1620_p10  ;;  %s1440_s16 = scalar_lea.vmem %s1439_s28, 32 }
 0x766   : > { %v1060_v36 = vadd.f32 %v1059_v35, %v1058_v34  ;;  %p1441_p7 = scmp.lt.s32.totalorder %s1086_s4, %s1439_s28  ;;  %p1442_p8 = scmp.lt.s32.totalorder %s1440_s16, %s1434_s24 }
 0x767   : > { %p1437_p6 = pneg %p1436_p5 }
 0x768   : > { %v1061_v37 = vrot.slane %v1060_v36, 1  ;;  %p1443_p9 = por %p1442_p8, %p1441_p7 }
 0x76a   : > { %v1062_v39 = vadd.f32 %v1061_v37, %v1060_v36  ;;  %p1444_p12 = pnand %p1443_p9, %p1437_p6 }
 0x76c   : > { %v1064_v40 = vmul.f32 %v1395_v38, %v1062_v39 }
 0x76e   : > { %1066 = vst.msk [vmem:[%s414_s3] sm:$0x1] %vm1065_vm5, %v1064_v40 }
 0x76f   : > { %1447 = shalt.err (!%p1444_p12)
}
 0x770   : > { %s1448_s20 = scalar_lea.hbm %s1083_s1, 16  ;;  %s1452_s2 = scalar_lea.hbm %s1901_s12, 32 }
 0x771   : > { %p1449_p13 = scmp.ne.s32.totalorder %s1083_s1, %s1448_s20  ;;  %p1453_p2 = scmp.lt.s32.totalorder %s1083_s1, %s1901_s12 }
 0x772   : > { %p1454_p3 = scmp.lt.s32.totalorder %s1452_s2, %s1448_s20 }
 0x773   : > { %p1450_p0 = pnand %p1449_p13, %p1620_p10 }
 0x774   : > { %p1455_p4 = por %p1454_p3, %p1453_p2 }
 0x775   : > { %p1451_p1 = pneg %p1450_p0 }
 0x777   : > { %p1456_p5 = pnand %p1455_p4, %p1451_p1 }
 0x779   : > { %1459 = shalt.err (!%p1456_p5)
}
 0x77a   : > { %1339 = dma.vmem_to_hbm [thread:$0]  (%p1620_p10), %s1086_s4, 16, %s1083_s1, %s1068_s17  }
 0x77b PF: > { %p1350_p6 = scmp.ge.s32.totalorder %s1500_s15, 2  ;;  %s1110_s27 = sand.u32 1, %s1488_s30  }
 0x77c   : > { %s1111_s24 = scalar_lea.sflag [#allocation5], %s1110_s27 }
 0x77d   : > { %p1344_p7 = pnand %p1350_p6, %p1624_p11 }
 0x77f   : > { %p1345_p8 = pneg %p1344_p7 }
 0x781   : > { %1479 = dma.done.wait (%p1345_p8), %s1111_s24, 16  }
 0x782   : > { %1481 = vsyncadd (%p1345_p8), %s1111_s24, 4294967280  ;;  %s1119_s29 = scalar_lea.sflag [#allocation7], %s1110_s27 }
 0x783   : > { %1483 = dma.done.wait (%p1345_p8), %s1119_s29, 128  }
 0x784   : > { %1485 = vsyncadd (%p1345_p8), %s1119_s29, 4294967168  ;;  %p33_p10 = scmp.ge.s32.totalorder %s1607_s18, 4   ;;  %s1915_s30 = smov %s1492_s0 }
 0x785   : > { %s1916_s0 = smov %s1496_s14  ;;  %s1917_s14 = smov %s1618_s21 }
 0x786   : > { %s1918_s15 = smov %s1607_s18  ;;  %35 = sbr.rel (!%p33_p10) target bundleno = 22 (0x16), region = 116 }
 0x78b   :  { %1124 = vsyncpa [#allocation5], 1 }
 0x78c   :  { %1126 = vsyncpa [#allocation5 + $0x1], 1 }
 0x78d   :  { %1127 = vsyncpa [#allocation7], 1 }
 0x78e   :  { %1129 = vsyncpa [#allocation7 + $0x1], 1 }

</bundles_post_ra>
